<compile_context>
chip_gen: v5e
topology: v5e:2x2
jax: 0.10.0
libtpu: 0.0.40
codegen_flags: <defaults>
</compile_context>

<pallas_src>
import functools

import jax
import jax.numpy as jnp
from jax.experimental import pallas as pl
from jax.experimental.pallas import tpu as pltpu

STATE_DIM = 12 * 4   # 48
HIDDEN_DIM = 128
ACTION_DIM = 4

DEFAULT_TB = 2048    # rows per grid step; a few MiB of VMEM incl. double buffers


def qnet_kernel(x_ref, w1_ref, b1_ref, w2_ref, b2_ref, o_ref):
    # Cast to bf16 in VMEM (free next to the HBM stream of x) and run fc1 on
    # the MXU with an f32 accumulator: (TB, 48) @ (48, 128) -> (TB, 128) f32.
    x_bf = x_ref[...].astype(jnp.bfloat16)
    w1_bf = w1_ref[...].astype(jnp.bfloat16)
    h = jnp.dot(x_bf, w1_bf, preferred_element_type=jnp.float32)
    # Epilogue in f32 on the accumulator (bias + ReLU).
    h = jnp.maximum(h + b1_ref[...], 0.0)
    # fc2: (TB, 128) @ (128, 4) -> (TB, 4) f32.  N=4 is tiny; its cost is
    # negligible next to streaming x, so no special handling.
    out = jnp.dot(h.astype(jnp.bfloat16), w2_ref[...].astype(jnp.bfloat16),
                  preferred_element_type=jnp.float32)
    o_ref[...] = (out + b2_ref[...]).astype(o_ref.dtype)
    # TODO(synk): the (TB, 4) output lane-dim forces masked stores; a
    # lane-dense (TB/32, 128) view would remove them, but the in-kernel
    # relayout crosses (8,128) tiles and output bytes are already negligible.


@functools.partial(jax.jit, static_argnames=("tb",))
def qnet_forward(x, w1, b1, w2, b2, *, tb=DEFAULT_TB):
    """x: (B, STATE_DIM) f32 -> (B, ACTION_DIM) f32."""
    B = x.shape[0]
    # Tile size: never larger than the (8-rounded) batch so small batches run
    # in a single grid step; rounding keeps the sublane constraint satisfied.
    tb = min(tb, ((B + 7) // 8) * 8)
    b_pad = pl.cdiv(B, tb) * tb
    if b_pad != B:
        x = jnp.pad(x, ((0, b_pad - B), (0, 0)))

    out = pl.pallas_call(
        qnet_kernel,
        out_shape=jax.ShapeDtypeStruct((b_pad, ACTION_DIM), jnp.float32),
        grid=(b_pad // tb,),
        in_specs=[
            pl.BlockSpec((tb, STATE_DIM), lambda i: (i, 0)),          # x tile
            pl.BlockSpec((STATE_DIM, HIDDEN_DIM), lambda i: (0, 0)),  # w1 resident
            pl.BlockSpec((1, HIDDEN_DIM), lambda i: (0, 0)),          # b1 resident
            pl.BlockSpec((HIDDEN_DIM, ACTION_DIM), lambda i: (0, 0)), # w2 resident
            pl.BlockSpec((1, ACTION_DIM), lambda i: (0, 0)),          # b2 resident
        ],
        out_specs=pl.BlockSpec((tb, ACTION_DIM), lambda i: (i, 0)),
        compiler_params=pltpu.CompilerParams(
            dimension_semantics=("parallel",)),
    )(x, w1, b1, w2, b2)
    return out[:B]


def init_params(key):
    """Deterministic synthetic parameters (PyTorch-Linear-like uniform init)."""
    k1, k2, k3, k4 = jax.random.split(key, 4)
    bound1 = 1.0 / jnp.sqrt(STATE_DIM)
    bound2 = 1.0 / jnp.sqrt(HIDDEN_DIM)
    # Stored as (in, out) — i.e. already transposed relative to torch weight.
    w1 = jax.random.uniform(k1, (STATE_DIM, HIDDEN_DIM), jnp.float32, -bound1, bound1)
    b1 = jax.random.uniform(k2, (1, HIDDEN_DIM), jnp.float32, -bound1, bound1)
    w2 = jax.random.uniform(k3, (HIDDEN_DIM, ACTION_DIM), jnp.float32, -bound2, bound2)
    b2 = jax.random.uniform(k4, (1, ACTION_DIM), jnp.float32, -bound2, bound2)
    return w1, b1, w2, b2


def qnet_ref(x, w1, b1, w2, b2):
    """JAX reference matching the kernel's precision (bf16 dots, f32 accum)."""
    xb, w1b, w2b = (a.astype(jnp.bfloat16) for a in (x, w1, w2))
    h = jnp.dot(xb, w1b, preferred_element_type=jnp.float32) + b1
    h = jnp.maximum(h, 0.0)
    return jnp.dot(h.astype(jnp.bfloat16), w2b,
                   preferred_element_type=jnp.float32) + b2


if __name__ == "__main__":
    key = jax.random.PRNGKey(0)
    kx, kx2, kp = jax.random.split(key, 3)
    w1, b1, w2, b2 = init_params(kp)

    # Small smoke test: single grid step, block == full (rounded) batch.
    B = 32
    x = jax.random.normal(kx, (B, STATE_DIM), jnp.float32)
    out = jax.block_until_ready(qnet_forward(x, w1, b1, w2, b2))
    ref = qnet_ref(x, w1, b1, w2, b2)
    assert out.shape == (B, ACTION_DIM)
    assert jnp.allclose(out, ref, atol=1e-3, rtol=1e-3), "mismatch vs JAX reference (B=32)"

    # Multi-tile path: grid > 1, batch not a multiple of the tile (pad + slice).
    B2 = 1000
    x2 = jax.random.normal(kx2, (B2, STATE_DIM), jnp.float32)
    out2 = jax.block_until_ready(qnet_forward(x2, w1, b1, w2, b2, tb=256))
    ref2 = qnet_ref(x2, w1, b1, w2, b2)
    assert out2.shape == (B2, ACTION_DIM)
    assert jnp.allclose(out2, ref2, atol=1e-3, rtol=1e-3), "mismatch vs JAX reference (B=1000)"

    print("KERNEL_OK")
</pallas_src>

<mosaic_0001>
module attributes {stable_mosaic.version = 11 : i64} {
  func.func @qnet_kernel(%arg0: i32, %arg1: memref<32x48xf32, #tpu.memory_space<vmem>>, %arg2: memref<48x128xf32, #tpu.memory_space<vmem>>, %arg3: memref<1x128xf32, #tpu.memory_space<vmem>>, %arg4: memref<128x4xf32, #tpu.memory_space<vmem>>, %arg5: memref<1x4xf32, #tpu.memory_space<vmem>>, %arg6: memref<32x4xf32, #tpu.memory_space<vmem>>) attributes {dimension_semantics = [#tpu.dimension_semantics<parallel>], iteration_bounds = array<i64: 1>, scalar_prefetch = 0 : i64, scratch_operands = 0 : i64, tpu.core_type = #tpu.core_type<tc>, window_params = [{transform_indices = @transform_0, window_bounds = array<i64: 32, 48>}, {pipeline_mode = #tpu.pipeline_mode<synchronous>, transform_indices = @transform_1, window_bounds = array<i64: 48, 128>}, {pipeline_mode = #tpu.pipeline_mode<synchronous>, transform_indices = @transform_2, window_bounds = array<i64: 1, 128>}, {pipeline_mode = #tpu.pipeline_mode<synchronous>, transform_indices = @transform_3, window_bounds = array<i64: 128, 4>}, {pipeline_mode = #tpu.pipeline_mode<synchronous>, transform_indices = @transform_4, window_bounds = array<i64: 1, 4>}, {transform_indices = @transform_5, window_bounds = array<i64: 32, 4>}]} {
    %c0 = arith.constant 0 : index
    %c0_0 = arith.constant 0 : index
    %0 = vector.load %arg1[%c0, %c0_0] : memref<32x48xf32, #tpu.memory_space<vmem>>, vector<32x48xf32>
    %1 = arith.truncf %0 : vector<32x48xf32> to vector<32x48xbf16>
    %c0_1 = arith.constant 0 : index
    %c0_2 = arith.constant 0 : index
    %2 = vector.load %arg2[%c0_1, %c0_2] : memref<48x128xf32, #tpu.memory_space<vmem>>, vector<48x128xf32>
    %3 = arith.truncf %2 : vector<48x128xf32> to vector<48x128xbf16>
    %cst = arith.constant dense<0.000000e+00> : vector<32x128xf32>
    %4 = tpu.matmul %1, %3, %cst {dimension_numbers = #tpu.dot_dimension_numbers<[1], [0], [0], [1], [0, 0, 1, 1], [], []>} : vector<32x48xbf16>, vector<48x128xbf16>, vector<32x128xf32> -> vector<32x128xf32>
    %c0_3 = arith.constant 0 : index
    %c0_4 = arith.constant 0 : index
    %5 = vector.load %arg3[%c0_3, %c0_4] : memref<1x128xf32, #tpu.memory_space<vmem>>, vector<1x128xf32>
    %6 = vector.broadcast %5 : vector<1x128xf32> to vector<32x128xf32>
    %7 = arith.addf %4, %6 : vector<32x128xf32>
    %cst_5 = arith.constant 0.000000e+00 : f32
    %8 = vector.broadcast %cst_5 : f32 to vector<32x128xf32>
    %9 = arith.maximumf %7, %8 : vector<32x128xf32>
    %10 = arith.truncf %9 : vector<32x128xf32> to vector<32x128xbf16>
    %c0_6 = arith.constant 0 : index
    %c0_7 = arith.constant 0 : index
    %11 = vector.load %arg4[%c0_6, %c0_7] : memref<128x4xf32, #tpu.memory_space<vmem>>, vector<128x4xf32>
    %12 = arith.truncf %11 : vector<128x4xf32> to vector<128x4xbf16>
    %cst_8 = arith.constant dense<0.000000e+00> : vector<32x4xf32>
    %13 = tpu.matmul %10, %12, %cst_8 {dimension_numbers = #tpu.dot_dimension_numbers<[1], [0], [0], [1], [0, 0, 1, 1], [], []>} : vector<32x128xbf16>, vector<128x4xbf16>, vector<32x4xf32> -> vector<32x4xf32>
    %c0_9 = arith.constant 0 : index
    %c0_10 = arith.constant 0 : index
    %14 = vector.load %arg5[%c0_9, %c0_10] : memref<1x4xf32, #tpu.memory_space<vmem>>, vector<1x4xf32>
    %15 = vector.broadcast %14 : vector<1x4xf32> to vector<32x4xf32>
    %16 = arith.addf %13, %15 : vector<32x4xf32>
    %c0_11 = arith.constant 0 : index
    %c0_12 = arith.constant 0 : index
    %17 = vector.load %arg6[%c0_11, %c0_12] : memref<32x4xf32, #tpu.memory_space<vmem>>, vector<32x4xf32>
    tpu.vector_store %arg6[%c0_11, %c0_12], %16 {strides = array<i32>} : memref<32x4xf32, #tpu.memory_space<vmem>>, vector<32x4xf32>,
    return
  }
  func.func @transform_0(%arg0: i32) -> (i32, i32) {
    %c0_i32 = arith.constant 0 : i32
    %c0_i32_0 = arith.constant 0 : i32
    return %arg0, %c0_i32 : i32, i32
  }
  func.func @transform_1(%arg0: i32) -> (i32, i32) {
    %c0_i32 = arith.constant 0 : i32
    %c0_i32_0 = arith.constant 0 : i32
    %c0_i32_1 = arith.constant 0 : i32
    return %c0_i32, %c0_i32_0 : i32, i32
  }
  func.func @transform_2(%arg0: i32) -> (i32, i32) {
    %c0_i32 = arith.constant 0 : i32
    %c0_i32_0 = arith.constant 0 : i32
    %c0_i32_1 = arith.constant 0 : i32
    return %c0_i32, %c0_i32_0 : i32, i32
  }
  func.func @transform_3(%arg0: i32) -> (i32, i32) {
    %c0_i32 = arith.constant 0 : i32
    %c0_i32_0 = arith.constant 0 : i32
    %c0_i32_1 = arith.constant 0 : i32
    return %c0_i32, %c0_i32_0 : i32, i32
  }
  func.func @transform_4(%arg0: i32) -> (i32, i32) {
    %c0_i32 = arith.constant 0 : i32
    %c0_i32_0 = arith.constant 0 : i32
    %c0_i32_1 = arith.constant 0 : i32
    return %c0_i32, %c0_i32_0 : i32, i32
  }
  func.func @transform_5(%arg0: i32) -> (i32, i32) {
    %c0_i32 = arith.constant 0 : i32
    %c0_i32_0 = arith.constant 0 : i32
    return %arg0, %c0_i32 : i32, i32
  }
}

</mosaic_0001>

<bundles_post_ra>
// kernel: qnet_forward.1
= control target key start
LH: loop header
LB: loop body
LE: loop exit
PB: predicated region body
PF: predicated region fallthrough
CT: control target
= control target key end

     0   :  { %vm40_vm0 = vcmask 392192   ;;  %vm119_vm1 = vcmask 31744   ;;  %s266_s1 = inlined_call_operand.vmem [shape: f32[48,128], index: 1, kind: input, shape index: {}]   ;;  %s267_s3 = inlined_call_operand.vmem [shape: f32[128,4], index: 3, kind: input, shape index: {}]   ;;  %s268_s0 = inlined_call_operand.vmem [shape: f32[32,48], index: 0, kind: input, shape index: {}]   ;;  %s269_s2 = inlined_call_operand.vmem [shape: f32[1,128], index: 2, kind: input, shape index: {}]   ;;  %s270_s4 = inlined_call_operand.vmem [shape: f32[1,4], index: 4, kind: input, shape index: {}]   ;;  %s271_s5 = inlined_call_operand.vmem [shape: f32[32,4], index: 5, kind: output, shape index: {}]  }
   0x1   :  { %v31_v0 = vld [vmem:[%s266_s1 + $0x20] sm:$0xff]  ;;  %v32_v1 = vld [vmem:[%s266_s1 + $0x28] sm:$0xff]  ;;  %v29_v2 = vld [vmem:[%s266_s1 + $0x10] sm:$0xff] }
   0x2   :  { %v35_v3 = vpack.c.bf16 %v32_v1, %v31_v0  ;;  %v30_v4 = vld [vmem:[%s266_s1 + $0x18] sm:$0xff]  ;;  %v27_v6 = vld [vmem:[%s266_s1] sm:$0xff]  ;;  %v86_v7 = vld [vmem:[%s267_s3 + $0x70] sm:$0xff] }
   0x3   :  { %v34_v5 = vpack.c.bf16 %v30_v4, %v29_v2  ;;  %v87_v8 = vld [vmem:[%s267_s3 + $0x78] sm:$0xff]  ;;  %v28_v9 = vld [vmem:[%s266_s1 + $0x8] sm:$0xff]  ;;  %v84_v11 = vld [vmem:[%s267_s3 + $0x60] sm:$0xff] }
   0x4   :  { %52 = vmatpush.bf16.msra.mxu0 %v35_v3  ;;  %v95_v10 = vpack.c.bf16 %v87_v8, %v86_v7  ;;  %v85_v12 = vld [vmem:[%s267_s3 + $0x68] sm:$0xff]  ;;  %v21_v13 = vld [vmem:[%s268_s0] sm:$0xff]  ;;  %v33_v15 = vpack.c.bf16 %v28_v9, %v27_v6  ;;  %v82_v17 = vld [vmem:[%s267_s3 + $0x50] sm:$0xff] }
   0x5   :  { %v94_v14 = vpack.c.bf16 %v85_v12, %v84_v11  ;;  %v22_v16 = vld [vmem:[%s268_s0 + $0x8] sm:$0xff]  ;;  %v83_v18 = vld [vmem:[%s267_s3 + $0x58] sm:$0xff]  ;;  %v80_v21 = vld [vmem:[%s267_s3 + $0x40] sm:$0xff] }
   0x6   :  { %100 = vmatpush.bf16.msra.mxu1 %v95_v10  ;;  %130 = vmatpush.bf16.msra.mxu2 %v95_v10  ;;  %v25_v19 = vpack.c.bf16 %v22_v16, %v21_v13  ;;  %v93_v20 = vpack.c.bf16 %v83_v18, %v82_v17  ;;  %v81_v22 = vld [vmem:[%s267_s3 + $0x48] sm:$0xff]  ;;  %v23_v24 = vld [vmem:[%s268_s0 + $0x10] sm:$0xff]  ;;  %v24_v25 = vld [vmem:[%s268_s0 + $0x18] sm:$0xff] }
   0x7   :  { %v92_v23 = vpack.c.bf16 %v81_v22, %v80_v21  ;;  %v26_v26 = vpack.c.bf16 %v24_v25, %v23_v24  ;;  %v78_v27 = vld [vmem:[%s267_s3 + $0x30] sm:$0xff]  ;;  %v79_v28 = vld [vmem:[%s267_s3 + $0x38] sm:$0xff]  ;;  %v76_v30 = vld [vmem:[%s267_s3 + $0x20] sm:$0xff] }
   0x8   :  { %53 = vmatpush.bf16.msra.mxu0 %v34_v5  ;;  %v91_v29 = vpack.c.bf16 %v79_v28, %v78_v27  ;;  %v77_v31 = vld [vmem:[%s267_s3 + $0x28] sm:$0xff]  ;;  %v74_v33 = vld [vmem:[%s267_s3 + $0x10] sm:$0xff]  ;;  %v75_v34 = vld [vmem:[%s267_s3 + $0x18] sm:$0xff] }
   0x9   :  { %v90_v32 = vpack.c.bf16 %v77_v31, %v76_v30  ;;  %v89_v35 = vpack.c.bf16 %v75_v34, %v74_v33  ;;  %v72_v36 = vld [vmem:[%s267_s3] sm:$0xff]  ;;  %v73_v37 = vld [vmem:[%s267_s3 + $0x8] sm:$0xff] }
   0xa   :  { %101 = vmatpush.bf16.msra.mxu1 %v94_v14  ;;  %131 = vmatpush.bf16.msra.mxu2 %v94_v14  ;;  %v88_v38 = vpack.c.bf16 %v73_v37, %v72_v36  ;;  %v138_v40 = vld [vmem:[%s269_s2] ss:$0 sm:$0xff] }
   0xb   :  { %v139_v54 = vld [vmem:[%s270_s4] ss:$0 sm:$0xff] }
   0xc   :  { %54 = vmatpush.bf16.msra.mxu0 %v33_v15 }
   0xe   :  { %102 = vmatpush.bf16.msra.mxu1 %v93_v20  ;;  %132 = vmatpush.bf16.msra.mxu2 %v93_v20 }
   0xf   :  { %128 = vmatmul.msk.bf16.vlgmr.msra.gmra.mxu0 %vm40_vm0, %v25_v19 }
  0x12   :  { %103 = vmatpush.bf16.msra.mxu1 %v92_v23  ;;  %133 = vmatpush.bf16.msra.mxu2 %v92_v23 }
  0x16   :  { %104 = vmatpush.bf16.msra.mxu1 %v91_v29  ;;  %134 = vmatpush.bf16.msra.mxu2 %v91_v29 }
  0x1a   :  { %105 = vmatpush.bf16.msra.mxu1 %v90_v32  ;;  %135 = vmatpush.bf16.msra.mxu2 %v90_v32 }
  0x1e   :  { %106 = vmatpush.bf16.msra.mxu1 %v89_v35  ;;  %136 = vmatpush.bf16.msra.mxu2 %v89_v35 }
  0x1f   :  { %129 = vmatmul.msk.bf16.gmra.mxu0 %vm40_vm0, %v26_v26 }
  0x22   :  { %107 = vmatpush.bf16.msra.mxu1 %v88_v38  ;;  %137 = vmatpush.bf16.msra.mxu2 %v88_v38 }
  0x8c   :  { %v56_v39 = vpop.f32.mrf.mxu0 }
  0x8d   :  { %v57_v41 = vadd.f32 %v138_v40, %v56_v39 }
  0x8f   :  { %v66_v44 = vmax.f32 %v57_v41, 0.0 }
  0x94   :  { %v58_v42 = vpop.f32.mrf.mxu0 }
  0x95   :  { %v59_v43 = vadd.f32 %v138_v40, %v58_v42 }
  0x97   :  { %v67_v45 = vmax.f32 %v59_v43, 0.0 }
  0x99   :  { %v70_v46 = vpack.c.bf16 %v67_v45, %v66_v44 }
  0x9b   :  { %108 = vmatmul.bf16.vlgmr.msra.gmra.mxu1 %v70_v46 }
  0x9c   :  { %v61_v47 = vpop.f32.mrf.mxu0 }
  0x9d   :  { %v62_v48 = vadd.f32 %v138_v40, %v61_v47 }
  0x9f   :  { %v68_v51 = vmax.f32 %v62_v48, 0.0 }
  0xa4   :  { %v63_v49 = vpop.f32.mrf.mxu0 }
  0xa5   :  { %v64_v50 = vadd.f32 %v138_v40, %v63_v49 }
  0xa7   :  { %v69_v52 = vmax.f32 %v64_v50, 0.0 }
  0xa9   :  { %v71_v53 = vpack.c.bf16 %v69_v52, %v68_v51 }
  0xab   :  { %113 = vmatmul.bf16.vlgmr.msra.gmra.mxu2 %v71_v53 }
 0x118   :  { %v109_v55 = vpop.f32.mrf.mxu1 }
 0x119   :  { %v110_v56 = vadd.f32 %v139_v54, %v109_v55 }
 0x11b   :  { %120 = vst.msk [vmem:[%s271_s5] sm:$0xff] %vm119_vm1, %v110_v56 }
 0x120   :  { %v111_v57 = vpop.f32.mrf.mxu1 }
 0x121   :  { %v112_v58 = vadd.f32 %v139_v54, %v111_v57 }
 0x123   :  { %121 = vst.msk [vmem:[%s271_s5 + $0x8] sm:$0xff] %vm119_vm1, %v112_v58 }
 0x12e   :  { %v114_v59 = vpop.f32.mrf.mxu2 }
 0x12f   :  { %v115_v60 = vadd.f32 %v139_v54, %v114_v59 }
 0x131   :  { %122 = vst.msk [vmem:[%s271_s5 + $0x10] sm:$0xff] %vm119_vm1, %v115_v60 }
 0x136   :  { %v116_v61 = vpop.f32.mrf.mxu2 }
 0x137   :  { %v117_v62 = vadd.f32 %v139_v54, %v116_v61 }
 0x139   :  { %123 = vst.msk [vmem:[%s271_s5 + $0x18] sm:$0xff] %vm119_vm1, %v117_v62 }

</bundles_post_ra>
